<compile_context>
chip_gen: v7x
topology: tpu7x:2x2x1
jax: 0.10.0
libtpu: 0.0.40
codegen_flags: <defaults>
</compile_context>

<pallas_src>
import functools

import numpy as np
import jax
import jax.numpy as jnp
from jax.experimental import pallas as pl
from jax.experimental.pallas import tpu as pltpu


_MIN_CHUNK_BYTES = 1 << 20  # aim for >= ~1 MiB per DMA descriptor (v7x guidance)
_MAX_CHUNKS = 8             # a handful of outstanding descriptors is plenty


def _plan_body_chunks(B, S, D, itemsize):
    """Static plan: split the body copy into a few rectangular chunk DMAs.

    Returns (axis, [(lo, size), ...]) where axis is "B" or "S".  All values are
    Python ints (shapes are static), so the kernel unrolls over them.
    """
    if S <= 1:
        return "B", []
    body_bytes = B * (S - 1) * D * itemsize
    n = int(max(1, min(_MAX_CHUNKS, body_bytes // _MIN_CHUNK_BYTES)))
    if B >= n:
        axis, length = "B", B
    elif (S - 1) >= n:
        axis, length = "S", S - 1
    else:
        axis, length, n = "B", B, 1
    base, rem = divmod(length, n)
    chunks, lo = [], 0
    for c in range(n):
        sz = base + (1 if c < rem else 0)
        chunks.append((lo, sz))
        lo += sz
    return axis, chunks


def _right_shift_kernel(axis, chunks, sos_hbm, x_hbm, o_hbm, sems):
    """Single grid step; the right-shift lives purely in DMA addressing."""
    B, S, D = x_hbm.shape  # static
    copies = []

    # Head: out[:, 0:1, :] <- sos broadcast.  One strided HBM->HBM DMA covering
    # every batch (per-batch stride S*D, contiguous extent D).
    head = pltpu.make_async_copy(sos_hbm, o_hbm.at[:, pl.ds(0, 1), :], sems.at[0])
    head.start()
    copies.append(head)

    # Body: out[:, 1:S, :] <- x[:, 0:S-1, :], as a few independent rectangular
    # chunk DMAs (start all, then wait all -> descriptors overlap).
    for c, (lo, sz) in enumerate(chunks):
        if axis == "B":
            src = x_hbm.at[pl.ds(lo, sz), pl.ds(0, S - 1), :]
            dst = o_hbm.at[pl.ds(lo, sz), pl.ds(1, S - 1), :]
        else:  # axis == "S"
            src = x_hbm.at[:, pl.ds(lo, sz), :]
            dst = o_hbm.at[:, pl.ds(lo + 1, sz), :]
        cp = pltpu.make_async_copy(src, dst, sems.at[1 + c])
        cp.start()
        copies.append(cp)

    # Drain.  Head (row 0) and body (rows 1..S-1) write disjoint regions, so
    # every output element is written exactly once.
    for cp in copies:
        cp.wait()


def right_shift(x: jax.Array, sos: jax.Array) -> jax.Array:
    """Pallas implementation of RightShift.forward.

    x   : (B, *, D) with ndim >= 3 (the torch flatten(1, -2) contract)
    sos : (D,) learnable start-of-sentence embedding
    """
    assert x.ndim >= 3, "RightShift expects x of shape (B, ..., D) with ndim >= 3"
    x_shape = x.shape
    B, D = x_shape[0], x_shape[-1]
    S = int(np.prod(x_shape[1:-1]))
    itemsize = jnp.dtype(x.dtype).itemsize

    x_flat = x.reshape(B, S, D)
    # Output dtype follows x (standard same-dtype decoder usage).  If sos were
    # kept f32 while x is bf16 this intentionally downcasts the SOS row.
    sos_b = jnp.broadcast_to(
        jnp.asarray(sos, dtype=x.dtype).reshape(1, 1, D), (B, 1, D)
    )

    axis, chunks = _plan_body_chunks(B, S, D, itemsize)
    n_sems = 1 + len(chunks)

    out = pl.pallas_call(
        functools.partial(_right_shift_kernel, axis, chunks),
        out_shape=jax.ShapeDtypeStruct((B, S, D), x.dtype),
        grid_spec=pltpu.PrefetchScalarGridSpec(
            num_scalar_prefetch=0,
            grid=(1,),  # single step: all batches handled by strided DMAs
            in_specs=[
                pl.BlockSpec(memory_space=pl.ANY),  # sos broadcast (B,1,D), HBM
                pl.BlockSpec(memory_space=pl.ANY),  # x (B,S,D), HBM
            ],
            out_specs=pl.BlockSpec(memory_space=pl.ANY),  # out (B,S,D), HBM
            scratch_shapes=[pltpu.SemaphoreType.DMA((n_sems,))],
        ),
        compiler_params=pltpu.CompilerParams(
            dimension_semantics=("arbitrary",),
        ),
        # Pure bandwidth op: tell XLA so it can overlap it with neighbors.
        cost_estimate=pl.CostEstimate(
            flops=0,
            transcendentals=0,
            bytes_accessed=2 * B * S * D * itemsize,
        ),
    )(sos_b, x_flat)

    return out.reshape(x_shape)


if __name__ == "__main__":
    key = jax.random.PRNGKey(0)
    k_x, k_sos = jax.random.split(key)

    # Small video-GPT style shapes: (B, T1, T2, D), lane-dense D.
    B, T1, T2, D = 2, 4, 8, 128
    x = jax.random.normal(k_x, (B, T1, T2, D), dtype=jnp.float32)
    # matches nn.Parameter(FloatTensor(D).normal_(std=0.02))
    sos = 0.02 * jax.random.normal(k_sos, (D,), dtype=jnp.float32)

    out = jax.block_until_ready(right_shift(x, sos))

    # pure-JAX reference
    x_flat = x.reshape(B, T1 * T2, D)
    ref = jnp.concatenate(
        [jnp.broadcast_to(sos, (B, 1, D)), x_flat[:, :-1, :]], axis=1
    ).reshape(x.shape)

    assert out.shape == x.shape and out.dtype == x.dtype
    np.testing.assert_allclose(np.asarray(out), np.asarray(ref), rtol=1e-6, atol=1e-6)
    print("KERNEL_OK")
</pallas_src>

<mosaic_0001>
module attributes {stable_mosaic.version = 11 : i64} {
  func.func @_right_shift_kernel(%arg0: i32, %arg1: memref<2x1x128xf32, #tpu.memory_space<any>>, %arg2: memref<2x32x128xf32, #tpu.memory_space<any>>, %arg3: memref<2x32x128xf32, #tpu.memory_space<any>>, %arg4: memref<2x!tpu.dma_semaphore, #tpu.memory_space<semaphore_mem>>) attributes {dimension_semantics = [#tpu.dimension_semantics<arbitrary>], iteration_bounds = array<i64: 1>, scalar_prefetch = 0 : i64, scratch_operands = 1 : i64, tpu.core_type = #tpu.core_type<tc>, window_params = [{}, {}, {}]} {
    %c0_i32 = arith.constant 0 : i32
    %c0_i32_0 = arith.constant 0 : i32
    %c0_i32_1 = arith.constant 0 : i32
    %c0_i32_2 = arith.constant 0 : i32
    %0 = tpu.memref_slice %arg3[%c0_i32_0, %c0_i32_1, %c0_i32_2] : memref<2x32x128xf32, #tpu.memory_space<any>> -> memref<2x1x128xf32, #tpu.memory_space<any>>
    %1 = tpu.memref_slice %arg4[%c0_i32] : memref<2x!tpu.dma_semaphore, #tpu.memory_space<semaphore_mem>> -> memref<1x!tpu.dma_semaphore, #tpu.memory_space<semaphore_mem>>
    %2 = tpu.memref_squeeze %1 : memref<1x!tpu.dma_semaphore, #tpu.memory_space<semaphore_mem>> -> memref<!tpu.dma_semaphore, #tpu.memory_space<semaphore_mem>>
    tpu.enqueue_dma source(%arg1 : memref<2x1x128xf32, #tpu.memory_space<any>>) target(%0 : memref<2x1x128xf32, #tpu.memory_space<any>>) target_semaphore(%2 : memref<!tpu.dma_semaphore, #tpu.memory_space<semaphore_mem>>)
    %c1_i32 = arith.constant 1 : i32
    %c0_i32_3 = arith.constant 0 : i32
    %c0_i32_4 = arith.constant 0 : i32
    %c0_i32_5 = arith.constant 0 : i32
    %3 = tpu.memref_slice %arg2[%c0_i32_3, %c0_i32_4, %c0_i32_5] : memref<2x32x128xf32, #tpu.memory_space<any>> -> memref<2x31x128xf32, #tpu.memory_space<any>>
    %c0_i32_6 = arith.constant 0 : i32
    %c1_i32_7 = arith.constant 1 : i32
    %c0_i32_8 = arith.constant 0 : i32
    %4 = tpu.memref_slice %arg3[%c0_i32_6, %c1_i32_7, %c0_i32_8] : memref<2x32x128xf32, #tpu.memory_space<any>> -> memref<2x31x128xf32, #tpu.memory_space<any>>
    %5 = tpu.memref_slice %arg4[%c1_i32] : memref<2x!tpu.dma_semaphore, #tpu.memory_space<semaphore_mem>> -> memref<1x!tpu.dma_semaphore, #tpu.memory_space<semaphore_mem>>
    %6 = tpu.memref_squeeze %5 : memref<1x!tpu.dma_semaphore, #tpu.memory_space<semaphore_mem>> -> memref<!tpu.dma_semaphore, #tpu.memory_space<semaphore_mem>>
    tpu.enqueue_dma source(%3 : memref<2x31x128xf32, #tpu.memory_space<any>>) target(%4 : memref<2x31x128xf32, #tpu.memory_space<any>>) target_semaphore(%6 : memref<!tpu.dma_semaphore, #tpu.memory_space<semaphore_mem>>)
    %c0_i32_9 = arith.constant 0 : i32
    %c0_i32_10 = arith.constant 0 : i32
    %c0_i32_11 = arith.constant 0 : i32
    %c0_i32_12 = arith.constant 0 : i32
    %7 = tpu.memref_slice %arg3[%c0_i32_10, %c0_i32_11, %c0_i32_12] : memref<2x32x128xf32, #tpu.memory_space<any>> -> memref<2x1x128xf32, #tpu.memory_space<any>>
    %8 = tpu.memref_slice %arg4[%c0_i32_9] : memref<2x!tpu.dma_semaphore, #tpu.memory_space<semaphore_mem>> -> memref<1x!tpu.dma_semaphore, #tpu.memory_space<semaphore_mem>>
    %9 = tpu.memref_squeeze %8 : memref<1x!tpu.dma_semaphore, #tpu.memory_space<semaphore_mem>> -> memref<!tpu.dma_semaphore, #tpu.memory_space<semaphore_mem>>
    tpu.wait_dma2 semaphore(%9 : memref<!tpu.dma_semaphore, #tpu.memory_space<semaphore_mem>>) src(%arg1 : memref<2x1x128xf32, #tpu.memory_space<any>>) dst(%7 : memref<2x1x128xf32, #tpu.memory_space<any>>)
    %c1_i32_13 = arith.constant 1 : i32
    %c0_i32_14 = arith.constant 0 : i32
    %c0_i32_15 = arith.constant 0 : i32
    %c0_i32_16 = arith.constant 0 : i32
    %10 = tpu.memref_slice %arg2[%c0_i32_14, %c0_i32_15, %c0_i32_16] : memref<2x32x128xf32, #tpu.memory_space<any>> -> memref<2x31x128xf32, #tpu.memory_space<any>>
    %c0_i32_17 = arith.constant 0 : i32
    %c1_i32_18 = arith.constant 1 : i32
    %c0_i32_19 = arith.constant 0 : i32
    %11 = tpu.memref_slice %arg3[%c0_i32_17, %c1_i32_18, %c0_i32_19] : memref<2x32x128xf32, #tpu.memory_space<any>> -> memref<2x31x128xf32, #tpu.memory_space<any>>
    %12 = tpu.memref_slice %arg4[%c1_i32_13] : memref<2x!tpu.dma_semaphore, #tpu.memory_space<semaphore_mem>> -> memref<1x!tpu.dma_semaphore, #tpu.memory_space<semaphore_mem>>
    %13 = tpu.memref_squeeze %12 : memref<1x!tpu.dma_semaphore, #tpu.memory_space<semaphore_mem>> -> memref<!tpu.dma_semaphore, #tpu.memory_space<semaphore_mem>>
    tpu.wait_dma2 semaphore(%13 : memref<!tpu.dma_semaphore, #tpu.memory_space<semaphore_mem>>) src(%10 : memref<2x31x128xf32, #tpu.memory_space<any>>) dst(%11 : memref<2x31x128xf32, #tpu.memory_space<any>>)
    return
  }
}

</mosaic_0001>

<bundles_post_ra>
// kernel: tpu_custom_call.1
= control target key start
LH: loop header
LB: loop body
LE: loop exit
PB: predicated region body
PF: predicated region fallthrough
CT: control target
= control target key end

     0   :  { %s83_s9 = smov 16   ;;  %s84_s10 = smov 512   ;;  %s119_s0 = inlined_call_operand.hbm [shape: f32[2,1,128], index: 0, kind: input, shape index: {}]   ;;  %s120_s1 = inlined_call_operand.hbm [shape: f32[2,32,128], index: 1, kind: input, shape index: {}]   ;;  %s121_s2 = inlined_call_operand.hbm [shape: f32[2,32,128], index: 2, kind: output, shape index: {}]  }
   0x1   :  { %19 = sst [smem:[#allocation4]] %s83_s9  ;;  %s85_s11 = smov 1  }
   0x2   :  { %21 = sst [smem:[#allocation4 + $0x1]] %s84_s10  ;;  %s86_s12 = smov [#allocation2]  }
   0x3   :  { %23 = sst [smem:[#allocation4 + $0x2]] %s85_s11  ;;  %s87_s13 = smov [#allocation3]  }
   0x4   :  { %s88_s14 = smov 0   ;;  %s26_s21 = scalar_lea.hbm %s121_s2, 16 }
   0x5   :  { %25 = dma.general %s119_s0, 32, %s121_s2, %s86_s12, %s87_s13, [#allocation4], %s88_s14, 0  }
   0x6   :  { %40 = sst [smem:[#allocation6]] %s84_s10  ;;  %s89_s22 = smov 31  }
   0x7   :  { %42 = sst [smem:[#allocation6 + $0x1]] %s84_s10  ;;  %s90_s23 = smov [#allocation2 + $0x1]  }
   0x8   :  { %44 = sst [smem:[#allocation6 + $0x2]] %s89_s22  ;;  %s91_s24 = smov [#allocation5]  }
   0x9   :  { %46 = dma.general %s120_s1, 992, %s26_s21, %s90_s23, %s91_s24, [#allocation6], %s88_s14, 0  }
   0xa   :  { %79 = dma.done.wait [#allocation2], 32 }
   0xb   :  { %80 = vsyncadd [#allocation2], 4294967264 }
   0xc   :  { %81 = dma.done.wait [#allocation2 + $0x1], 992 }
   0xd   :  { %82 = vsyncadd [#allocation2 + $0x1], 4294966304 }
   0xe   :  { %55 = vsyncmov [#allocation2] }
  0x11   :  { %s56_s0 = vpop.sfrf %55 }
  0x12   :  { %p68_p0 = scmp.ne.s32.totalorder %s56_s0, 0 }
  0x14   :  { %60 = shalt.err (%p68_p0)  }
  0x15   :  { %62 = vsyncmov [#allocation2 + $0x1] }
  0x18   :  { %s63_s27 = vpop.sfrf %62 }
  0x19   :  { %p69_p1 = scmp.ne.s32.totalorder %s63_s27, 0 }
  0x1b   :  { %67 = shalt.err (%p69_p1)  }

</bundles_post_ra>
